<compile_context>
chip_gen: v6e
topology: v6e:2x2x1
jax: 0.10.0
libtpu: 0.0.40
codegen_flags: <defaults>
</compile_context>

<pallas_src>
import numpy as np
import jax
import jax.numpy as jnp
from jax.experimental import pallas as pl
from jax.experimental.pallas import tpu as pltpu

_LANES = 128


def _pe_add_kernel(x_ref, pe_ref, o_ref):
    # Pure elementwise add on identically-shaped VMEM tiles.
    o_ref[...] = x_ref[...] + pe_ref[...]


def make_positional_encoding_table(d_model, max_len=5000, dtype=jnp.float32):
    """Deterministic sinusoidal table, identical to the PyTorch __init__ buffer."""
    position = jnp.arange(0, max_len, dtype=jnp.float32)[:, None]          # (max_len, 1)
    div_term = jnp.exp(
        jnp.arange(0, d_model, 2, dtype=jnp.float32) * (-np.log(10000.0) / d_model)
    )                                                                       # (d_model//2,)
    pe = jnp.zeros((max_len, d_model), dtype=jnp.float32)
    pe = pe.at[:, 0::2].set(jnp.sin(position * div_term))
    pe = pe.at[:, 1::2].set(jnp.cos(position * div_term))
    return pe.astype(dtype)[None, :, :]                                     # (1, max_len, d_model)


def _vmem_budget():
    """Generation-aware (block_bytes, vmem_limit_bytes)."""
    try:
        cap = pltpu.get_tpu_info().vmem_capacity_bytes
    except Exception:
        cap = 64 * 1024 * 1024  # conservative: assume v7x-sized VMEM
    if cap >= 128 * 1024 * 1024:
        # v5e / v6e: 128 MiB physical VMEM -> big tiles, generous scoped limit.
        return 8 * 1024 * 1024, 64 * 1024 * 1024
    # v7x: 64 MiB per TensorCore -> 6 double-buffered 4 MiB slabs ~ 24 MiB + scratch.
    return 4 * 1024 * 1024, 40 * 1024 * 1024


def positional_encoding_forward(x, pe_table, *, target_block_bytes=None, donate_x=False):
    """x: (B, S, D); pe_table: (1, max_len, D). Returns x + pe[:, :S] (same as PyTorch)."""
    B, S, D = x.shape
    _, max_len, Dp = pe_table.shape
    assert Dp == D and S <= max_len
    itemsize = x.dtype.itemsize

    block_bytes, vmem_limit = _vmem_budget()
    if target_block_bytes is not None:
        block_bytes = target_block_bytes

    # Cast ONLY the rows actually used: leading-row slice is contiguous, so this
    # touches S*D elements instead of max_len*D (the dominant waste when S << max_len).
    pe_used = pe_table[:, :S, :]
    if pe_used.dtype != x.dtype:
        pe_used = pe_used.astype(x.dtype)

    # Sublane packing per dtype: f32 -> 8 rows, bf16 -> 16, int8/fp8 -> 32.
    sublane_align = max(8, 32 // itemsize)

    flat_ok = (S * D) % _LANES == 0
    R = (S * D) // _LANES if flat_ok else 0      # lane-dense rows per batch element

    if flat_ok and R >= sublane_align:
        # ---- Fast path: lane-dense, row-tiled, PE tile resident across batch. ----
        x_flat = x.reshape(B, R, _LANES)                 # free row-major reshape
        pe_flat = pe_used.reshape(1, R, _LANES)          # sliced table only, same extent as x rows

        rows_per_block = max(sublane_align, block_bytes // (_LANES * itemsize))
        TR = min(R, rows_per_block)
        TR = max(sublane_align, (TR // sublane_align) * sublane_align)
        num_r = pl.cdiv(R, TR)                           # partial last block is masked by Pallas

        cost = pl.CostEstimate(
            flops=B * S * D,
            transcendentals=0,
            bytes_accessed=(2 * B * S * D + S * D) * itemsize,
        )
        out = pl.pallas_call(
            _pe_add_kernel,
            out_shape=jax.ShapeDtypeStruct((B, R, _LANES), x.dtype),
            grid_spec=pltpu.PrefetchScalarGridSpec(
                num_scalar_prefetch=0,
                grid=(num_r, B),   # batch innermost -> PE block index constant -> stays resident
                in_specs=[
                    pl.BlockSpec((1, TR, _LANES), lambda r, b: (b, r, 0)),  # x tile
                    pl.BlockSpec((1, TR, _LANES), lambda r, b: (0, r, 0)),  # shared PE tile
                ],
                out_specs=pl.BlockSpec((1, TR, _LANES), lambda r, b: (b, r, 0)),
            ),
            compiler_params=pltpu.CompilerParams(
                dimension_semantics=("parallel", "parallel"),
                vmem_limit_bytes=vmem_limit,
            ),
            cost_estimate=cost,
            input_output_aliases=({0: 0} if donate_x else {}),
        )(x_flat, pe_flat)
        return out.reshape(B, S, D)

    # ---- Fallback: S*D not lane-dense (D not a friendly multiple). Tile over S so
    # VMEM stays bounded and double-buffering survives even for large S*D. ----
    ts_cap = max(8, (block_bytes // max(1, D * itemsize)) // 8 * 8)
    TS = S if S <= 8 else min((S // 8) * 8, ts_cap)      # multiple of 8, or full S if tiny
    num_s = pl.cdiv(S, TS)
    return pl.pallas_call(
        _pe_add_kernel,
        out_shape=jax.ShapeDtypeStruct((B, S, D), x.dtype),
        grid_spec=pltpu.PrefetchScalarGridSpec(
            num_scalar_prefetch=0,
            grid=(num_s, B),   # batch innermost -> PE tile resident here too
            in_specs=[
                pl.BlockSpec((1, TS, D), lambda s, b: (b, s, 0)),
                pl.BlockSpec((1, TS, D), lambda s, b: (0, s, 0)),
            ],
            out_specs=pl.BlockSpec((1, TS, D), lambda s, b: (b, s, 0)),
        ),
        compiler_params=pltpu.CompilerParams(
            dimension_semantics=("parallel", "parallel"),
            vmem_limit_bytes=vmem_limit,
        ),
        input_output_aliases=({0: 0} if donate_x else {}),
    )(x, pe_used)


if __name__ == "__main__":
    key = jax.random.PRNGKey(0)
    k1, k2, k3, k4 = jax.random.split(key, 4)

    # Case 1: lane-dense fast path, S == max_len (full-table usage), f32.
    B, S, D, max_len = 2, 16, 128, 16
    x = jax.random.normal(k1, (B, S, D), dtype=jnp.float32)
    pe = make_positional_encoding_table(D, max_len=max_len)
    y = jax.block_until_ready(positional_encoding_forward(x, pe))
    np.testing.assert_allclose(np.asarray(y), np.asarray(x + pe[:, :S, :]),
                               rtol=1e-6, atol=1e-6)

    # Case 2: fast path with a partial last row tile (R % TR != 0), forced via a
    # tiny target_block_bytes so the grid has 2 row tiles with a masked tail.
    B2, S2, D2, max_len2 = 2, 24, 128, 64
    x2 = jax.random.normal(k2, (B2, S2, D2), dtype=jnp.float32)
    pe2 = make_positional_encoding_table(D2, max_len=max_len2)
    y2 = jax.block_until_ready(
        positional_encoding_forward(x2, pe2, target_block_bytes=16 * _LANES * 4))
    np.testing.assert_allclose(np.asarray(y2), np.asarray(x2 + pe2[:, :S2, :]),
                               rtol=1e-6, atol=1e-6)

    # Case 3: bf16 fast path (exercises dtype-aware TR alignment and sliced-table cast).
    B3, S3, D3, max_len3 = 2, 16, 128, 512
    x3 = jax.random.normal(k3, (B3, S3, D3), dtype=jnp.float32).astype(jnp.bfloat16)
    pe3 = make_positional_encoding_table(D3, max_len=max_len3)
    y3 = jax.block_until_ready(positional_encoding_forward(x3, pe3))
    y3_ref = x3 + pe3[:, :S3, :].astype(jnp.bfloat16)
    np.testing.assert_allclose(np.asarray(y3, dtype=np.float32),
                               np.asarray(y3_ref, dtype=np.float32), rtol=1e-2, atol=1e-2)

    # Case 4: fallback path (odd D), with S tiling and a masked partial S tile.
    B4, S4, D4, max_len4 = 2, 20, 36, 64
    x4 = jax.random.normal(k4, (B4, S4, D4), dtype=jnp.float32)
    pe4 = make_positional_encoding_table(D4, max_len=max_len4)
    y4 = jax.block_until_ready(
        positional_encoding_forward(x4, pe4, target_block_bytes=16 * D4 * 4))
    np.testing.assert_allclose(np.asarray(y4), np.asarray(x4 + pe4[:, :S4, :]),
                               rtol=1e-6, atol=1e-6)

    print("KERNEL_OK")
</pallas_src>

<mosaic_0001>
module attributes {stable_mosaic.version = 11 : i64} {
  func.func @_pe_add_kernel(%arg0: i32, %arg1: i32, %arg2: memref<1x16x128xf32, #tpu.memory_space<vmem>>, %arg3: memref<1x16x128xf32, #tpu.memory_space<vmem>>, %arg4: memref<1x16x128xf32, #tpu.memory_space<vmem>>) attributes {dimension_semantics = [#tpu.dimension_semantics<parallel>, #tpu.dimension_semantics<parallel>], iteration_bounds = array<i64: 1, 2>, scalar_prefetch = 0 : i64, scratch_operands = 0 : i64, tpu.core_type = #tpu.core_type<tc>, window_params = [{transform_indices = @transform_0, window_bounds = array<i64: 1, 16, 128>}, {transform_indices = @transform_1, window_bounds = array<i64: 1, 16, 128>}, {transform_indices = @transform_2, window_bounds = array<i64: 1, 16, 128>}]} {
    %c0 = arith.constant 0 : index
    %c0_0 = arith.constant 0 : index
    %c0_1 = arith.constant 0 : index
    %0 = vector.load %arg2[%c0, %c0_0, %c0_1] : memref<1x16x128xf32, #tpu.memory_space<vmem>>, vector<1x16x128xf32>
    %c0_2 = arith.constant 0 : index
    %c0_3 = arith.constant 0 : index
    %c0_4 = arith.constant 0 : index
    %1 = vector.load %arg3[%c0_2, %c0_3, %c0_4] : memref<1x16x128xf32, #tpu.memory_space<vmem>>, vector<1x16x128xf32>
    %2 = arith.addf %0, %1 : vector<1x16x128xf32>
    %c0_5 = arith.constant 0 : index
    %c0_6 = arith.constant 0 : index
    %c0_7 = arith.constant 0 : index
    %3 = vector.load %arg4[%c0_5, %c0_6, %c0_7] : memref<1x16x128xf32, #tpu.memory_space<vmem>>, vector<1x16x128xf32>
    tpu.vector_store %arg4[%c0_5, %c0_6, %c0_7], %2 {strides = array<i32>} : memref<1x16x128xf32, #tpu.memory_space<vmem>>, vector<1x16x128xf32>,
    return
  }
  func.func @transform_0(%arg0: i32, %arg1: i32) -> (i32, i32, i32) {
    %c0_i32 = arith.constant 0 : i32
    %c0_i32_0 = arith.constant 0 : i32
    return %arg1, %arg0, %c0_i32 : i32, i32, i32
  }
  func.func @transform_1(%arg0: i32, %arg1: i32) -> (i32, i32, i32) {
    %c0_i32 = arith.constant 0 : i32
    %c0_i32_0 = arith.constant 0 : i32
    %c0_i32_1 = arith.constant 0 : i32
    return %c0_i32, %arg0, %c0_i32_0 : i32, i32, i32
  }
  func.func @transform_2(%arg0: i32, %arg1: i32) -> (i32, i32, i32) {
    %c0_i32 = arith.constant 0 : i32
    %c0_i32_0 = arith.constant 0 : i32
    return %arg1, %arg0, %c0_i32 : i32, i32, i32
  }
}

</mosaic_0001>

<bundles_post_ra>
// kernel: tpu_custom_call.1
= control target key start
LH: loop header
LB: loop body
LE: loop exit
PB: predicated region body
PF: predicated region fallthrough
CT: control target
= control target key end

     0   :  { %7 = vsyncpa [#allocation3], 0  ;;  %s774_s0 = inlined_call_operand.hbm [shape: f32[2,16,128], index: 0, kind: input, shape index: {}]   ;;  %s775_s1 = inlined_call_operand.hbm [shape: f32[1,16,128], index: 1, kind: input, shape index: {}]   ;;  %s776_s2 = inlined_call_operand.hbm [shape: f32[2,16,128], index: 2, kind: output, shape index: {}]  }
   0x1   :  { %9 = vsyncpa [#allocation3 + $0x1], 0 }
   0x2   :  { %10 = vsyncpa [#allocation6], 0 }
   0x3   :  { %11 = vsyncpa [#allocation4], 0 }
   0x4   :  { %13 = vsyncpa [#allocation4 + $0x1], 0  ;;  %s587_s9 = smov 0   ;;  %s589_s10 = smov 0  }
   0x5   :  { %s591_s11 = smov 0   ;;  %s593_s12 = smov 0  }
   0x6   :  { %s595_s13 = smov 0   ;;  %s597_s14 = smov 0  }
   0x7 LB: > { %s329_s15 = sadd.s32 4294967295, %s563_s14   ;;  %s330_s16 = sadd.s32 4294967294, %s563_s14   ;;  %s563_s14 = sphi %s597_s14, %s19_s14   ;;  %s559_s13 = sphi %s595_s13, %s796_s13   ;;  %s555_s12 = sphi %s593_s12, %s795_s12   ;;  %s551_s11 = sphi %s591_s11, %s794_s11   ;;  %s547_s10 = sphi %s589_s10, %s793_s10   ;;  %s543_s9 = sphi %s587_s9, %s792_s9  }
   0x8   : > { %p53_p0 = scmp.ne.s32.totalorder %s547_s10, %s543_s9  ;;  %p621_p1 = scmp.eq.s32.totalorder %s329_s15, 0 }
   0x9   : > { %p625_p2 = scmp.eq.s32.totalorder %s329_s15, 1  ;;  %p111_p3 = scmp.eq.s32.totalorder %s330_s16, 1 }
   0xa   : > { %p631_p4 = por %p621_p1, %p53_p0  ;;  %p331_p5 = scmp.ge.s32.totalorder %s563_s14, 1 }
   0xb   : > { %p636_p6 = por %p111_p3, %p53_p0  ;;  %p118_p7 = scmp.lt.s32.totalorder %s563_s14, 3 }
   0xc   : > { %s781_s19 = scalar_select %p631_p4, 1, 0 }
   0xd   : > { %s782_s20 = scalar_select %p636_p6, 1, 0 }
   0xe   : > { %p641_p8 = pnand %p331_p5, %p118_p7  ;;  %s565_s22 = smov [#allocation5]  }
   0xf   : > { %s133_s23 = sshll.u32 %s565_s22, 4  ;;  %s28_s25 = sadd.s32 1, %s559_s13  ;;  %s134_s23 = int_to_ptr.vmem [resolvable:$true] %s133_s23 }
  0x10   : > { %p356_p9 = pneg %p641_p8  ;;  %s436_s26 = scalar_lea.vmem %s134_s23, 256 }
  0x11   : > { %p437_p13 = scmp.ne.s32.totalorder %s134_s23, %s436_s26  ;;  %p444_p5 = scmp.lt.s32.totalorder %s134_s23, %s134_s23 }
  0x12   : > { %p650_p11 = pnand %p356_p9, %p621_p1  ;;  %p445_p7 = scmp.lt.s32.totalorder %s436_s26, %s436_s26 }
  0x14   : > { %p427_p12 = pneg %p650_p11  ;;  %p446_p6 = por %p445_p7, %p444_p5 }
  0x16   : > { %p439_p0 = pnand %p437_p13, %p427_p12 }
  0x18   : > { %p440_p3 = pneg %p439_p0 }
  0x1a   : > { %p447_p4 = pnand %p446_p6, %p440_p3 }
  0x1c   : > { %450 = shalt.err (!%p447_p4)
}
  0x1d   : > { %s778_s27 = smov 128   ;;  %s567_s28 = smov 8  }
  0x1e   : > { %359 = dma.hbm_to_vmem [thread:$0]  (!%p650_p11), %s775_s1, 256, %s134_s23, [#allocation6], %s778_s27, %s778_s27, %s567_s28  }
  0x1f   : > { %p29_p4 = scmp.ge.s32.totalorder %s28_s25, 2  ;;  %s40_s3 = sadd.s32 1, %s551_s11 }
  0x20   : > { %p47_p6 = scmp.ne.s32.totalorder %s551_s11, %s547_s10  ;;  %p48_p9 = scmp.eq.s32.totalorder %s563_s14, 0 }
  0x21   : > { %s798_s25 = smov (%p29_p4, %s28_s25), 0  ;;  %p369_p0 = scmp.lt.s32.totalorder %s563_s14, 2 }
  0x22   : > { %p671_p12 = por %p48_p9, %p47_p6  ;;  %p677_p13 = por %p625_p2, %p47_p6 }
  0x23   : > { %s35_s6 = ssub.s32 %s559_s13, %s798_s25  ;;  %s147_s7 = sand.u32 1, %s551_s11  }
  0x24   : > { %p38_p11 = scmp.eq.s32.totalorder %s35_s6, 0  ;;  %s334_s8 = sshll.u32 %s147_s7, 4 }
  0x25   : > { %s346_s16 = sshll.u32 %s559_s13, 8  ;;  %s151_s26 = scalar_lea.vmem [#allocation2], %s334_s8 }
  0x26   : > { %s686_s15 = scalar_select %p38_p11, %s551_s11, %s40_s3  }
  0x27   : > { %s159_s24 = scalar_lea.hbm %s774_s0, %s346_s16  ;;  %s160_s29 = sshll.u32 %s151_s26, 4  ;;  %s161_s29 = int_to_ptr.vmem [resolvable:$true] %s160_s29 }
  0x28   : > { %p694_p2 = pnand %p369_p0, %p671_p12  ;;  %s148_s30 = scalar_lea.sflag [#allocation3], %s147_s7 }
  0x29   : > { %s464_s6 = scalar_lea.vmem %s161_s29, 256  ;;  %s568_s3 = smov [#allocation2]  }
  0x2a   : > { %p453_p3 = pneg %p694_p2  ;;  %p465_p5 = scmp.ne.s32.totalorder %s161_s29, %s464_s6 }
  0x2b   : > { %s469_s27 = sshll.u32 %s568_s3, 4  ;;  %s470_s27 = int_to_ptr.vmem [resolvable:$false] %s469_s27 }
  0x2c   : > { %p467_p7 = pnand %p465_p5, %p453_p3  ;;  %s471_s16 = scalar_lea.vmem %s470_s27, 512 }
  0x2d   : > { %p472_p6 = scmp.lt.s32.totalorder %s161_s29, %s470_s27  ;;  %p473_p9 = scmp.lt.s32.totalorder %s471_s16, %s464_s6 }
  0x2e   : > { %p468_p4 = pneg %p467_p7 }
  0x2f   : > { %p474_p11 = por %p473_p9, %p472_p6 }
  0x31   : > { %p475_p10 = pnand %p474_p11, %p468_p4 }
  0x33   : > { %478 = shalt.err (!%p475_p10)
}
  0x34   : > { %s788_s4 = smov 128   ;;  %172 = sbr.rel (%p641_p8) target bundleno = 85 (0x55), region = 28 }
  0x35   : > { %363 = dma.hbm_to_vmem [thread:$0]  (!%p694_p2), %s159_s24, 256, %s161_s29, %s148_s30, %s788_s4, %s788_s4, %s567_s28  }
  0x36   : > { %s708_s7 = sand.u32 (!%p641_p8), 1, %s547_s10   ;;  %p789_p12 = scmp.ne.s32.totalorder (!%p641_p8), %s781_s19, 0 }
  0x37   : > { %s338_s27 = sshll.u32 (!%p641_p8), %s708_s7, 4  ;;  %s175_s8 = scalar_lea.sflag (!%p641_p8), [#allocation3], %s708_s7 }
  0x38   : > { %s178_s22 = scalar_lea.vmem (!%p641_p8), [#allocation2], %s338_s27 }
  0x39   : > { %530 = dma.done.wait (%p789_p12), %s175_s8, 256  }
  0x3a   : > { %532 = vsyncadd (%p789_p12), %s175_s8, 4294967040 }
  0x3b   : > { %534 = dma.done.wait (%p621_p1), [#allocation6], 256  }
  0x3c   : > { %536 = vsyncadd (%p621_p1), [#allocation6], 4294967040  ;;  %s202_s21 = scalar_lea.vmem [#allocation7], %s338_s27  ;;  %s347_s23 = sshll.u32 %s555_s12, 8  ;;  %v206_v0 = vld [vmem:[%s178_s22] sm:$0xff]  ;;  %v207_v2 = vld [vmem:[%s178_s22 + $0x8] sm:$0xff] }
  0x3d   : > { %s230_s28 = sshll.u32 %s202_s21, 4  ;;  %v208_v1 = vld [vmem:[#allocation5] sm:$0xff]  ;;  %v209_v4 = vld [vmem:[#allocation5 + $0x8] sm:$0xff]  ;;  %s726_s17 = scalar_lea.hbm %s776_s2, %s347_s23  ;;  %s721_s28 = int_to_ptr.vmem [resolvable:$true] %s230_s28 }
  0x3e   : > { %v210_v3 = vadd.f32 %v208_v1, %v206_v0  ;;  %v211_v5 = vadd.f32 %v209_v4, %v207_v2  ;;  %s215_s26 = scalar_lea.sflag [#allocation4], %s708_s7  ;;  %s479_s12 = scalar_lea.vmem %s721_s28, 256 }
  0x3f   : > { %p480_p1 = scmp.ne.s32.totalorder %s721_s28, %s479_s12  ;;  %s569_s29 = smov [#allocation7]  }
  0x40   : > { %212 = vst [vmem:[%s202_s21] sm:$0xff] %v210_v3  ;;  %213 = vst [vmem:[%s202_s21 + $0x8] sm:$0xff] %v211_v5  ;;  %s483_s18 = sshll.u32 %s569_s29, 4  ;;  %s484_s18 = int_to_ptr.vmem [resolvable:$false] %s483_s18 }
  0x41   : > { %p481_p8 = pnand %p480_p1, %p677_p13  ;;  %s485_s30 = scalar_lea.vmem %s484_s18, 512 }
  0x42   : > { %p486_p0 = scmp.lt.s32.totalorder %s721_s28, %s484_s18  ;;  %p487_p2 = scmp.lt.s32.totalorder %s485_s30, %s479_s12 }
  0x43   : > { %p482_p10 = pneg %p481_p8 }
  0x44   : > { %p488_p3 = por %p487_p2, %p486_p0 }
  0x46   : > { %p489_p5 = pnand %p488_p3, %p482_p10 }
  0x48   : > { %492 = shalt.err (!%p489_p5)
}
  0x49   : > { %s493_s6 = scalar_lea.hbm %s726_s17, 256  ;;  %s497_s4 = scalar_lea.hbm %s776_s2, 512 }
  0x4a   : > { %p494_p7 = scmp.ne.s32.totalorder %s726_s17, %s493_s6  ;;  %p498_p9 = scmp.lt.s32.totalorder %s726_s17, %s776_s2 }
  0x4b   : > { %p499_p11 = scmp.lt.s32.totalorder %s497_s4, %s493_s6 }
  0x4c   : > { %p495_p4 = pnand %p494_p7, %p677_p13 }
  0x4d   : > { %p500_p12 = por %p499_p11, %p498_p9 }
  0x4e   : > { %p496_p6 = pneg %p495_p4 }
  0x50   : > { %p501_p1 = pnand %p500_p12, %p496_p6 }
  0x52   : > { %504 = shalt.err (!%p501_p1)
}
  0x53   : > { %s570_s22 = smov 128   ;;  %s571_s21 = smov 8  }
  0x54   : > { %354 = dma.vmem_to_hbm [thread:$0]  (%p677_p13), %s721_s28, 256, %s726_s17, %s215_s26, %s570_s22, %s570_s22, %s571_s21  }
  0x55 PF: > { %s245_s23 = sand.u32 1, %s543_s9   ;;  %p790_p8 = scmp.ne.s32.totalorder %s782_s20, 0 }
  0x56   : > { %p791_p10 = scmp.ge.s32.totalorder %s563_s14, 2  ;;  %s246_s19 = scalar_lea.sflag [#allocation4], %s245_s23 }
  0x58   : > { %p365_p0 = pnand %p791_p10, %p790_p8 }
  0x5a   : > { %p366_p2 = pneg %p365_p0 }
  0x5c   : > { %538 = dma.done.wait (%p366_p2), %s246_s19, 256  }
  0x5d   : > { %540 = vsyncadd (%p366_p2), %s246_s19, 4294967040  ;;  %s19_s14 = sadd.s32 1, %s563_s14   ;;  %s792_s9 = smov %s547_s10 }
  0x5e   : > { %p16_p3 = scmp.ge.s32.totalorder %s19_s14, 4   ;;  %s793_s10 = smov %s551_s11 }
  0x5f   : > { %s794_s11 = smov %s686_s15  ;;  %s795_s12 = smov %s559_s13 }
  0x60   : > { %s796_s13 = smov %s798_s25  ;;  %18 = sbr.rel (!%p16_p3) target bundleno = 7 (0x7), region = 78 }
  0x65   :  { %251 = vsyncpa [#allocation3], 1 }
  0x66   :  { %253 = vsyncpa [#allocation3 + $0x1], 1 }
  0x67   :  { %254 = vsyncpa [#allocation6], 1 }
  0x68   :  { %255 = vsyncpa [#allocation4], 1 }
  0x69   :  { %257 = vsyncpa [#allocation4 + $0x1], 1 }

</bundles_post_ra>
